<compile_context>
chip_gen: v5e
topology: v5e:2x2
jax: 0.10.0
libtpu: 0.0.40
codegen_flags: <defaults>
</compile_context>

<pallas_src>
import jax
import jax.numpy as jnp
from jax.experimental import pallas as pl
from jax.experimental.pallas import tpu as pltpu


def _blr_kernel(x_ref, w_ref, b_ref, o_ref):
    # x_ref: (tb, K) bf16  | current batch tile (streamed)
    # w_ref: (1, K)  bf16  | resident weight row
    # b_ref: (1, 1)  f32   | bias scalar in SMEM
    # o_ref: (1, tb) f32   | lane-dense output row for this tile
    # (1, K) @ (tb, K)^T -> (1, tb), f32 accumulation on the MXU.
    z = jax.lax.dot_general(
        w_ref[...], x_ref[...],
        dimension_numbers=(((1,), (1,)), ((), ())),
        preferred_element_type=jnp.float32,
    )
    z = z + b_ref[0, 0]
    o_ref[...] = jax.nn.sigmoid(z).astype(o_ref.dtype)


def _round_up(x, m):
    return (x + m - 1) // m * m


def _pick_tb(batch, n_inputs, itemsize=2):
    """Pick the batch-tile row count.

    Big enough to amortize the ~600-cycle per-step overhead (512-1024 rows hit
    ~85% of HBM roofline), small enough that the double-buffered x tiles fit
    the tightest VMEM (v7x: 64 MiB physical / 32 MiB scoped), and small enough
    to give >= 2 grid steps so the DMA pipeline overlaps and v7x can shard the
    batch axis across both TensorCores. Multiple of 16 (bf16 sublane packing).
    """
    budget_rows = (2 * 1024 * 1024) // max(n_inputs * itemsize, 1)  # ~2 MiB x tile
    tb = min(1024, max(16, budget_rows))
    half = _round_up(max(pl.cdiv(batch, 2), 1), 16)  # prefer >= 2 grid steps
    tb = min(tb, half)
    return max(16, (tb // 16) * 16)


def binary_logistic_regression(x, weight, bias, *, tb=None):
    """sigmoid(x @ weight.T + bias), nn.Linear layout.

    x: (B, n_inputs) float; weight: (1, n_inputs); bias: (1,)  ->  (B, 1) f32
    """
    B, K = x.shape
    assert weight.shape == (1, K), weight.shape

    # bf16 streaming operands (HBM-bound: halves x traffic); bias stays f32.
    x_bf = x.astype(jnp.bfloat16)
    w_bf = weight.astype(jnp.bfloat16).reshape(1, K)
    b_f32 = jnp.asarray(bias, jnp.float32).reshape(1, 1)

    if tb is None:
        tb = _pick_tb(B, K)
    else:
        tb = max(16, _round_up(tb, 16))

    b_pad = _round_up(max(B, 1), tb)
    if b_pad != B:
        x_bf = jnp.pad(x_bf, ((0, b_pad - B), (0, 0)))  # pad rows are harmless
    num_tiles = b_pad // tb

    out = pl.pallas_call(
        _blr_kernel,
        out_shape=jax.ShapeDtypeStruct((num_tiles, 1, tb), jnp.float32),
        grid_spec=pltpu.PrefetchScalarGridSpec(
            num_scalar_prefetch=0,
            grid=(num_tiles,),
            in_specs=[
                # x batch tile: streamed, double-buffered by the pipeline.
                pl.BlockSpec((tb, K), lambda i: (i, 0)),
                # weight row: resident in VMEM across all grid steps.
                pl.BlockSpec((1, K), lambda i: (0, 0)),
                # bias scalar: SMEM (no VMEM block / DMA descriptor).
                pl.BlockSpec(memory_space=pltpu.MemorySpace.SMEM),
            ],
            # Lane-dense output: one full-lane (1, tb) row per grid step.
            out_specs=pl.BlockSpec((None, 1, tb), lambda i: (i, 0, 0)),
        ),
        compiler_params=pltpu.CompilerParams(
            # Batch tiles are independent -> shard across TCs on v7x.
            dimension_semantics=("parallel",),
            # Explicit scoped-VMEM limit (v5e default is only 16 MiB); actual
            # usage is ~5 MiB with the ~2 MiB tile budget, well under v7x's
            # 64 MiB physical VMEM.
            vmem_limit_bytes=48 * 1024 * 1024,
        ),
    )(x_bf, w_bf, b_f32)

    # (num_tiles, 1, tb) -> (B, 1); drop padded rows.
    return out.reshape(b_pad, 1)[:B]


def reference_f32(x, weight, bias):
    return jax.nn.sigmoid(x @ weight.T + bias.reshape(1, 1))


def reference_bf16_matched(x, weight, bias):
    # Matches the kernel's arithmetic: bf16-rounded operands, f32 accumulate.
    xb = x.astype(jnp.bfloat16).astype(jnp.float32)
    wb = weight.astype(jnp.bfloat16).astype(jnp.float32)
    return jax.nn.sigmoid(xb @ wb.T + bias.reshape(1, 1).astype(jnp.float32))


if __name__ == "__main__":
    key = jax.random.PRNGKey(0)
    k_x, k_w, k_b = jax.random.split(key, 3)

    batch = 300      # ragged on purpose: exercises padding + a 2-step grid
    n_inputs = 32

    # nn.Linear default init: uniform(-1/sqrt(n_inputs), 1/sqrt(n_inputs)).
    bound = 1.0 / jnp.sqrt(jnp.float32(n_inputs))
    weight = jax.random.uniform(k_w, (1, n_inputs), jnp.float32, -bound, bound)
    bias = jax.random.uniform(k_b, (1,), jnp.float32, -bound, bound)
    x = jax.random.normal(k_x, (batch, n_inputs), jnp.float32)

    y = jax.block_until_ready(binary_logistic_regression(x, weight, bias))
    assert y.shape == (batch, 1), y.shape

    # Tight check against a bit-matched (bf16 inputs, f32 accumulate) reference.
    y_matched = reference_bf16_matched(x, weight, bias)
    assert jnp.allclose(y, y_matched, atol=1e-4, rtol=1e-4), float(
        jnp.max(jnp.abs(y - y_matched)))

    # Loose check against the full-f32 reference (bf16 input quantization only).
    y_f32 = reference_f32(x, weight, bias)
    assert jnp.allclose(y, y_f32, atol=1e-2), float(jnp.max(jnp.abs(y - y_f32)))

    print("KERNEL_OK")
</pallas_src>

<mosaic_0001>
module attributes {stable_mosaic.version = 11 : i64} {
  func.func @_blr_kernel(%arg0: i32, %arg1: memref<160x32xbf16, #tpu.memory_space<vmem>>, %arg2: memref<1x32xbf16, #tpu.memory_space<vmem>>, %arg3: memref<1x1xf32, #tpu.memory_space<smem>>, %arg4: memref<1x1x160xf32, #tpu.memory_space<vmem>>) attributes {dimension_semantics = [#tpu.dimension_semantics<parallel>], iteration_bounds = array<i64: 2>, scalar_prefetch = 0 : i64, scratch_operands = 0 : i64, tpu.core_type = #tpu.core_type<tc>, window_params = [{transform_indices = @transform_0, window_bounds = array<i64: 160, 32>}, {pipeline_mode = #tpu.pipeline_mode<synchronous>, transform_indices = @transform_1, window_bounds = array<i64: 1, 32>}, {transform_indices = @transform_2, window_bounds = array<i64: 1, 1>}, {transform_indices = @transform_3, window_bounds = array<i64: 1, 1, 160>}]} {
    %c0 = arith.constant 0 : index
    %c0_0 = arith.constant 0 : index
    %0 = vector.load %arg2[%c0, %c0_0] : memref<1x32xbf16, #tpu.memory_space<vmem>>, vector<1x32xbf16>
    %c0_1 = arith.constant 0 : index
    %c0_2 = arith.constant 0 : index
    %1 = vector.load %arg1[%c0_1, %c0_2] : memref<160x32xbf16, #tpu.memory_space<vmem>>, vector<160x32xbf16>
    %cst = arith.constant dense<0.000000e+00> : vector<1x160xf32>
    %2 = tpu.matmul %0, %1, %cst {dimension_numbers = #tpu.dot_dimension_numbers<[1], [1], [0], [0], [0, 0, 1, 0], [], []>} : vector<1x32xbf16>, vector<160x32xbf16>, vector<1x160xf32> -> vector<1x160xf32>
    %c0_3 = arith.constant 0 : index
    %c0_4 = arith.constant 0 : index
    %3 = memref.load %arg3[%c0_3, %c0_4] : memref<1x1xf32, #tpu.memory_space<smem>>
    %4 = vector.broadcast %3 : f32 to vector<1x160xf32>
    %5 = arith.addf %2, %4 : vector<1x160xf32>
    %6 = arith.negf %5 : vector<1x160xf32>
    %7 = math.exp %6 : vector<1x160xf32>
    %cst_5 = arith.constant 1.000000e+00 : f32
    %8 = vector.broadcast %cst_5 : f32 to vector<1x160xf32>
    %9 = arith.addf %8, %7 : vector<1x160xf32>
    %10 = arith.divf %8, %9 : vector<1x160xf32>
    %c0_6 = arith.constant 0 : index
    %c0_7 = arith.constant 0 : index
    %c0_8 = arith.constant 0 : index
    %11 = vector.load %arg4[%c0_6, %c0_7, %c0_8] : memref<1x1x160xf32, #tpu.memory_space<vmem>>, vector<1x1x160xf32>
    %12 = vector.shape_cast %11 : vector<1x1x160xf32> to vector<1x160xf32>
    %13 = vector.shape_cast %10 : vector<1x160xf32> to vector<1x1x160xf32>
    tpu.vector_store %arg4[%c0_6, %c0_7, %c0_8], %13 {strides = array<i32>} : memref<1x1x160xf32, #tpu.memory_space<vmem>>, vector<1x1x160xf32>,
    return
  }
  func.func @transform_0(%arg0: i32) -> (i32, i32) {
    %c0_i32 = arith.constant 0 : i32
    %c0_i32_0 = arith.constant 0 : i32
    return %arg0, %c0_i32 : i32, i32
  }
  func.func @transform_1(%arg0: i32) -> (i32, i32) {
    %c0_i32 = arith.constant 0 : i32
    %c0_i32_0 = arith.constant 0 : i32
    %c0_i32_1 = arith.constant 0 : i32
    return %c0_i32, %c0_i32_0 : i32, i32
  }
  func.func @transform_2(%arg0: i32) -> (i32, i32) {
    %c0_i32 = arith.constant 0 : i32
    %c0_i32_0 = arith.constant 0 : i32
    %c0_i32_1 = arith.constant 0 : i32
    return %c0_i32, %c0_i32_0 : i32, i32
  }
  func.func @transform_3(%arg0: i32) -> (i32, i32, i32) {
    %c0_i32 = arith.constant 0 : i32
    %c0_i32_0 = arith.constant 0 : i32
    %c0_i32_1 = arith.constant 0 : i32
    return %arg0, %c0_i32, %c0_i32_0 : i32, i32, i32
  }
}

</mosaic_0001>

<bundles_post_ra>
// kernel: tpu_custom_call.1
= control target key start
LH: loop header
LB: loop body
LE: loop exit
PB: predicated region body
PF: predicated region fallthrough
CT: control target
= control target key end

     0   :  { %s749_s0 = inlined_call_operand.vmem [shape: bf16[320,32], index: 0, kind: input, shape index: {}]   ;;  %s750_s1 = inlined_call_operand.vmem [shape: bf16[1,32], index: 1, kind: input, shape index: {}]   ;;  %s751_s2 = inlined_call_operand.<no memory space> [shape: f32[1,1], index: 2, kind: input, shape index: {}]   ;;  %s752_s3 = inlined_call_operand.hbm [shape: f32[2,1,160], index: 3, kind: output, shape index: {}]  }
   0x1   :  { %8 = sst [smem:[#allocation2]] %s751_s2 }
   0x2   :  { %9 = vsyncpa [#allocation4], 0 }
   0x3   :  { %11 = vsyncpa [#allocation4 + $0x1], 0  ;;  %s628_s14 = smov 0   ;;  %s630_s15 = smov 0  }
   0x4   :  { %s632_s16 = smov 0   ;;  %s634_s17 = smov 0  }
   0x5 LB: > { %s649_s2 = sadd.s32 4294967295, %s603_s17   ;;  %s430_s18 = sadd.s32 4294967294, %s603_s17   ;;  %s603_s17 = sphi %s634_s17, %s758_s17   ;;  %s599_s16 = sphi %s632_s16, %s757_s16   ;;  %s595_s15 = sphi %s630_s15, %s756_s15   ;;  %s591_s14 = sphi %s628_s14, %s755_s14  }
   0x6   : > { %s653_s19 = sadd.s32 1, %s603_s17   ;;  %s92_s20 = sadd.s32 1, %s599_s16 }
   0x7   : > { %s89_s21 = ssub.s32 %s603_s17, %s653_s19  ;;  %p102_p0 = scmp.ne.s32.totalorder %s599_s16, %s595_s15 }
   0x8   : > { %p90_p1 = scmp.eq.s32.totalorder %s89_s21, 0  ;;  %p103_p2 = scmp.eq.s32.totalorder %s649_s2, 1 }
   0x9   : > { %p108_p3 = scmp.ne.s32.totalorder %s595_s15, %s591_s14  ;;  %p109_p4 = scmp.eq.s32.totalorder %s430_s18, 1 }
   0xa   : > { %s664_s22 = scalar_select %p90_p1, %s599_s16, %s92_s20  }
   0xb   : > { %p666_p5 = por %p103_p2, %p102_p0  ;;  %p670_p6 = por %p109_p4, %p108_p3 }
   0xc   : > { %p433_p7 = scmp.ge.s32.totalorder %s603_s17, 1  ;;  %p142_p8 = scmp.lt.s32.totalorder %s603_s17, 3 }
   0xe   : > { %p143_p9 = pnand %p433_p7, %p142_p8 }
   0xf   : > { %s166_s25 = smul.u32 (!%p143_p9), 20, %s649_s2  ;;  %s194_s5 = sld [smem:[#allocation2]] (!%p143_p9) }
  0x10   : > { %146 = sbr.rel (%p143_p9) target bundleno = 249 (0xf9), region = 32  ;;  %s163_s6 = sand.u32 (!%p143_p9), 1, %s595_s15  }
  0x11   : > { %p167_p10 = scmp.lt.s32.totalorder (!%p143_p9), %s166_s25, 39  ;;  %s710_s7 = sshll.u32 (!%p143_p9), %s163_s6, 1 }
  0x12   : > { %s481_s8 = sshll.u32 (!%p143_p9), %s649_s2, 1  ;;  %s165_s12 = scalar_lea.vmem (!%p143_p9), [#allocation3], %s710_s7 }
  0x13   : > { %s366_s11 = scalar_lea.hbm (!%p143_p9), %s752_s3, %s481_s8  ;;  %s717_s13 = sshll.u32 (!%p143_p9), %s165_s12, 4  ;;  %s369_s13 = int_to_ptr.vmem [resolvable:$true] %s717_s13 }
  0x14   : > { %s370_s2 = sshll.u32 (!%p143_p9), %s366_s11, 4  ;;  %s356_s18 = scalar_lea.sflag (!%p143_p9), [#allocation4], %s163_s6  ;;  %s371_s2 = int_to_ptr.hbm [resolvable:$true] %s370_s2 }
  0x15   : > { %s760_s25 = smov (!%p167_p10, %s166_s25), 39  ;;  %vm246_vm0 = vcmask 261120   ;;  %v173_v10 = vld [vmem:[%s750_s1] sm:$0x1]  ;;  %v195_v23 = vstv %s194_s5  ;;  %v350_v49 = vlaneseq  ;;  %vm347_vm8 = vcmask 1040384   ;;  %s555_s20 = sshra.s32 %s371_s2, 4  ;;  %s556_s20 = int_to_ptr.hbm [resolvable:$true] %s555_s20 }
  0x16   : > { %s435_s26 = sshll.u32 %s760_s25, 2  ;;  %s557_s21 = scalar_lea.hbm %s556_s20, 2 }
  0x17   : > { %s680_s29 = scalar_lea.vmem %s749_s0, %s435_s26  ;;  %vm352_vm10 = vcmp.lt.s32.totalorder %v350_v49, 160  ;;  %p558_p11 = scmp.ne.s32.totalorder %s556_s20, %s557_s21 }
  0x18   : > { %v491_v0 = vld [vmem:[%s680_s29 + $0x38] sm:$0xff]  ;;  %v493_v1 = vld [vmem:[%s680_s29 + $0x48] sm:$0xff]  ;;  %v490_v4 = vld [vmem:[%s680_s29 + $0x30] sm:$0xff]  ;;  %s561_s27 = scalar_lea.hbm %s752_s3, 4  ;;  %p562_p0 = scmp.lt.s32.totalorder %s556_s20, %s752_s3 }
  0x19   : > { %v272_v2 = vsel %vm246_vm0, %v491_v0, 0  ;;  %v278_v3 = vsel %vm246_vm0, %v493_v1, 0  ;;  %v269_v5 = vsel %vm246_vm0, %v490_v4, 0  ;;  %v492_v6 = vld [vmem:[%s680_s29 + $0x40] sm:$0xff]  ;;  %v489_v8 = vld [vmem:[%s680_s29 + $0x28] sm:$0xff]  ;;  %v487_v13 = vld [vmem:[%s680_s29 + $0x18] sm:$0xff]  ;;  %p559_p12 = pnand %p558_p11, %p666_p5  ;;  %p563_p1 = scmp.lt.s32.totalorder %s561_s27, %s557_s21 }
  0x1a   : > { %280 = vmatpush.bf16.xpose.msra.mxu0 %v272_v2  ;;  %299 = vmatpush.bf16.xpose.msra.mxu1 %v278_v3  ;;  %v275_v7 = vsel %vm246_vm0, %v492_v6, 0  ;;  %v266_v9 = vsel %vm246_vm0, %v489_v8, 0  ;;  %v488_v11 = vld [vmem:[%s680_s29 + $0x20] sm:$0xff]  ;;  %v260_v14 = vsel %vm246_vm0, %v487_v13, 0  ;;  %v486_v15 = vld [vmem:[%s680_s29 + $0x10] sm:$0xff]  ;;  %v485_v17 = vld [vmem:[%s680_s29 + $0x8] sm:$0xff] }
  0x1b   : > { %v263_v12 = vsel %vm246_vm0, %v488_v11, 0  ;;  %v257_v16 = vsel %vm246_vm0, %v486_v15, 0  ;;  %v254_v18 = vsel %vm246_vm0, %v485_v17, 0  ;;  %v484_v19 = vld [vmem:[%s680_s29] sm:$0xff]  ;;  %p560_p13 = pneg %p559_p12  ;;  %p564_p2 = por %p563_p1, %p562_p0 }
  0x1c   : > { %v251_v20 = vsel %vm246_vm0, %v484_v19, 0 }
  0x1d   : > { %p565_p3 = pnand %p564_p2, %p560_p13 }
  0x22   : > { %281 = vmatpush.bf16.xpose.msra.mxu0 %v269_v5  ;;  %300 = vmatpush.bf16.xpose.msra.mxu1 %v275_v7 }
  0x29   : > { %477 = vmatmul.msk.bf16.vlgmr.msra.gmra.mxu1 %vm246_vm0, %v173_v10 }
  0x2a   : > { %282 = vmatpush.bf16.xpose.msra.mxu0 %v266_v9 }
  0x32   : > { %283 = vmatpush.bf16.xpose.msra.mxu0 %v263_v12 }
  0x3a   : > { %284 = vmatpush.bf16.xpose.msra.mxu0 %v260_v14 }
  0x42   : > { %285 = vmatpush.bf16.xpose.msra.mxu0 %v257_v16 }
  0x4a   : > { %286 = vmatpush.bf16.xpose.msra.mxu0 %v254_v18 }
  0x52   : > { %287 = vmatpush.bf16.xpose.msra.mxu0 %v251_v20 }
  0x59   : > { %476 = vmatmul.msk.bf16.vlgmr.msra.gmra.mxu0 %vm246_vm0, %v173_v10 }
  0xa6   : > { %v302_v21 = vpop.f32.mrf.mxu1 }
  0xa7   : > { %v303_v24 = vadd.f32 %v302_v21, %v195_v23 }
  0xa9   : > { %v479_v25 = vmul.f32 -1.442695, %v303_v24 }
  0xab   : > { %533 = vpow2.f32 %v479_v25 }
  0xae   : > { %v304_v22 = vpop.f32.mrf.mxu1 }
  0xb1   : > { %v534_v26 = vpop.eup %533 }
  0xb2   : > { %v313_v27 = vadd.f32 1.0, %v534_v26 }
  0xb4   : > { %535 = vrcp.f32 %v313_v27  ;;  %vm334_vm1 = vweird.f32 %v313_v27  ;;  %v340_v38 = vand.u32 2147483648, %v313_v27  ;;  %v338_v40 = vand.u32 2147483647, %v313_v27 }
  0xb6   : > { %v341_v43 = vor.u32 1.1754944e-38, %v340_v38  ;;  %vm339_vm4 = vcmp.eq.f32.partialorder %v338_v40, 8.507059e+37 }
  0xba   : > { %v536_v31 = vpop.eup %535 }
  0xbb   : > { %v330_v32 = vmul.f32 %v536_v31, %v313_v27  ;;  %vm335_vm2 = vweird.f32 %v536_v31 }
  0xbc   : > { %vm336_vm3 = vmor %vm334_vm1, %vm335_vm2 }
  0xbd   : > { %v331_v35 = vsub.f32 1.0, %v330_v32 }
  0xbf   : > { %v332_v37 = vmul.f32 %v536_v31, %v331_v35 }
  0xc1   : > { %v333_v39 = vadd.f32 %v536_v31, %v332_v37 }
  0xc3   : > { %v337_v45 = vsel %vm336_vm3, %v536_v31, %v333_v39 }
  0xc4   : > { %v342_v50 = vsel %vm339_vm4, %v341_v43, %v337_v45 }
  0xc5   : > { %v346_v54 = vrot.slane %v342_v50, 7 }
  0xd6   : > { %v289_v28 = vpop.f32.mrf.mxu0 }
  0xd7   : > { %v290_v29 = vadd.f32 %v289_v28, %v195_v23 }
  0xd9   : > { %v478_v30 = vmul.f32 -1.442695, %v290_v29 }
  0xdb   : > { %537 = vpow2.f32 %v478_v30 }
  0xde   : > { %v291_v33 = vpop.f32.mrf.mxu0 }
  0xe1   : > { %v538_v34 = vpop.eup %537 }
  0xe2   : > { %v312_v36 = vadd.f32 1.0, %v538_v34 }
  0xe4   : > { %539 = vrcp.f32 %v312_v36  ;;  %v325_v46 = vand.u32 2147483648, %v312_v36  ;;  %v323_v48 = vand.u32 2147483647, %v312_v36  ;;  %vm319_vm6 = vweird.f32 %v312_v36 }
  0xe6   : > { %v326_v52 = vor.u32 1.1754944e-38, %v325_v46  ;;  %vm324_vm9 = vcmp.eq.f32.partialorder %v323_v48, 8.507059e+37 }
  0xea   : > { %v540_v41 = vpop.eup %539 }
  0xeb   : > { %v315_v42 = vmul.f32 %v540_v41, %v312_v36  ;;  %vm320_vm5 = vweird.f32 %v540_v41 }
  0xec   : > { %vm321_vm7 = vmor %vm319_vm6, %vm320_vm5 }
  0xed   : > { %v316_v44 = vsub.f32 1.0, %v315_v42 }
  0xef   : > { %v317_v47 = vmul.f32 %v540_v41, %v316_v44 }
  0xf1   : > { %v318_v51 = vadd.f32 %v540_v41, %v317_v47 }
  0xf3   : > { %v322_v53 = vsel %vm321_vm7, %v540_v41, %v318_v51 }
  0xf4   : > { %v327_v55 = vsel %vm324_vm9, %v326_v52, %v322_v53 }
  0xf5   : > { %v348_v56 = vsel %vm347_vm8, %v327_v55, %v346_v54 }
  0xf6   : > { %354 = vst.msk [vmem:[%s165_s12] sm:$0x3] %vm352_vm10, %v348_v56 }
  0xf7   : > { %568 = shalt.err (!%p565_p3)
}
  0xf8   : > { %494 = dma.vmem_to_hbm [thread:$0]  (%p666_p5), %s369_s13, 32, %s371_s2, %s356_s18  }
  0xf9 PF: > { %p500_p4 = scmp.ge.s32.totalorder %s603_s17, 2  ;;  %s382_s30 = sand.u32 1, %s591_s14  }
  0xfa   : > { %s383_s4 = scalar_lea.sflag [#allocation4], %s382_s30 }
  0xfb   : > { %p497_p7 = pnand %p500_p4, %p670_p6 }
  0xfd   : > { %p498_p8 = pneg %p497_p7 }
  0xff   : > { %586 = dma.done.wait (%p498_p8), %s383_s4, 32  }
 0x100   : > { %588 = vsyncadd (%p498_p8), %s383_s4, 4294967264  ;;  %p14_p9 = scmp.ge.s32.totalorder %s653_s19, 4   ;;  %s755_s14 = smov %s595_s15 }
 0x101   : > { %s756_s15 = smov %s599_s16  ;;  %s757_s16 = smov %s664_s22 }
 0x102   : > { %s758_s17 = smov %s653_s19  ;;  %16 = sbr.rel (!%p14_p9) target bundleno = 5 (0x5), region = 67 }
 0x107   :  { %389 = vsyncpa [#allocation4], 1 }
 0x108   :  { %391 = vsyncpa [#allocation4 + $0x1], 1 }

</bundles_post_ra>
